<compile_context>
chip_gen: v7x
topology: tpu7x:2x2x1
jax: 0.10.0
libtpu: 0.0.40
codegen_flags: <defaults>
</compile_context>

<pallas_src>
import math
import jax
import jax.numpy as jnp
from jax.experimental import pallas as pl
from jax.experimental.pallas import tpu as pltpu

# ---- model hyper-parameters (small, consistent with the module) ----
STATE_DIM = 16
ACTION_DIM = 4
HIDDEN_DIM = 32
N_ATOMS = 51
PAD_ATOMS = 128                      # atom axis lane-padded to a full lane tile
LANE_W = ACTION_DIM * PAD_ATOMS      # 512: lane-dense head width
VMAX = 200.0
VMIN = 0.0
BATCH = 2
NEG = -1e30                          # padding logit bias: exp(NEG - m) == 0 in f32

# ---- packed parameter buffer row layout (single resident DMA for all params) ----
# All section starts are 8-sublane aligned.
R_W1 = 0                             # rows [0, 16)   : w1 (STATE_DIM, HIDDEN) in cols [0, 32)
R_W2 = R_W1 + STATE_DIM              # rows [16, 48)  : w2 (HIDDEN, HIDDEN)    in cols [0, 32)
R_W3 = R_W2 + HIDDEN_DIM             # rows [48, 80)  : w3 (HIDDEN, LANE_W), atoms lane-padded
R_B1 = R_W3 + HIDDEN_DIM             # row 80         : b1 in cols [0, 32)
R_B2 = R_B1 + 8                      # row 88         : b2 in cols [0, 32)
R_B3 = R_B2 + 8                      # row 96         : b3 (LANE_W), padded lanes = NEG
R_SEL = R_B3 + 8                     # rows [104,616) : block-diag support selector (LANE_W,128)
TOTAL_ROWS = R_SEL + LANE_W          # 616 (multiple of 8)


def _round_up(x, m):
    return ((x + m - 1) // m) * m


def qnet_kernel(x_ref, p_ref, dist_ref, q_ref, act_ref):
    """One batch tile of the full forward pass; params block is grid-resident."""
    x = x_ref[...]                                                     # (TB, S)

    # MLP: Linear -> ReLU -> Linear -> ReLU -> Linear (static, 8-aligned slices).
    w1 = p_ref[R_W1:R_W1 + STATE_DIM, :HIDDEN_DIM]
    b1 = p_ref[R_B1:R_B1 + 1, :HIDDEN_DIM]
    h1 = jnp.maximum(jnp.dot(x, w1, preferred_element_type=jnp.float32) + b1, 0.0)

    w2 = p_ref[R_W2:R_W2 + HIDDEN_DIM, :HIDDEN_DIM]
    b2 = p_ref[R_B2:R_B2 + 1, :HIDDEN_DIM]
    h2 = jnp.maximum(jnp.dot(h1, w2, preferred_element_type=jnp.float32) + b2, 0.0)

    w3 = p_ref[R_W3:R_W3 + HIDDEN_DIM, :]                              # (H, A*128)
    b3 = p_ref[R_B3:R_B3 + 1, :]                                       # (1, A*128), pad = NEG
    logits = jnp.dot(h2, w3, preferred_element_type=jnp.float32) + b3  # (TB, A*128)

    # Per-action softmax over the lane-padded atom axis. Each slice is a full 128-lane
    # tile (no shuffles); padded lanes have logit NEG -> exp 0, so softmax over 128 lanes
    # equals softmax over the 51 real atoms. One exact reciprocal per action, then mul.
    d_parts = []
    for a in range(ACTION_DIM):
        la = logits[:, a * PAD_ATOMS:(a + 1) * PAD_ATOMS]              # (TB, 128)
        m = jnp.max(la, axis=-1, keepdims=True)
        e = jnp.exp(la - m)
        s = jnp.sum(e, axis=-1, keepdims=True)
        inv = 1.0 / s                                                  # exact f32 (not approx)
        d_parts.append(jnp.maximum(e * inv, 0.001))                    # softmax + clamp(0.001)
    d = jnp.concatenate(d_parts, axis=-1)                              # (TB, A*128) lane-dense
    dist_ref[...] = d                                                  # one lane-dense store

    # q via one MXU matmul against the block-diagonal support selector:
    #   sel[a*128 + j, a] = support_pad[j]  (support_pad[j>=51] == 0 exactly, so the 0.001
    #   clamp on padded dist lanes contributes nothing). Result is lane-dense (TB, 128)
    #   with actions in lanes [0, ACTION_DIM); no per-column writes or lane shuffles.
    sel = p_ref[R_SEL:R_SEL + LANE_W, :PAD_ATOMS]                      # (A*128, 128)
    q128 = jnp.dot(d, sel, preferred_element_type=jnp.float32)         # (TB, 128)
    q_ref[...] = q128

    # Fused greedy action: argmax over the ACTION_DIM valid lanes (first index on ties),
    # built from max/min reductions only (cheap XLU work, slots are otherwise idle).
    lane = jax.lax.broadcasted_iota(jnp.int32, q128.shape, 1)          # (TB, 128)
    qm = jnp.where(lane < ACTION_DIM, q128, -jnp.inf)
    qmax = jnp.max(qm, axis=-1, keepdims=True)
    cand = jnp.where(qm == qmax, lane, PAD_ATOMS)
    act_ref[...] = jnp.min(cand, axis=-1, keepdims=True)               # (TB, 1) int32


def qnet_forward(state, packed_params, *, block_b=128):
    """Batched forward. Returns (dist (B,A,N_ATOMS), q (B,A), greedy_action (B,))."""
    B = state.shape[0]
    # 8-aligned batch tile; up to 128 rows per grid step so matmuls fill the MXU M dim.
    TB = min(block_b, _round_up(max(B, 1), 8))
    Bp = _round_up(B, TB)
    x = jnp.zeros((Bp, STATE_DIM), jnp.float32).at[:B].set(state.astype(jnp.float32))

    dist_flat, q128, act = pl.pallas_call(
        qnet_kernel,
        grid=(Bp // TB,),
        in_specs=[
            pl.BlockSpec((TB, STATE_DIM), lambda i: (i, 0)),           # state tiles pipeline
            pl.BlockSpec((TOTAL_ROWS, LANE_W), lambda i: (0, 0)),      # params VMEM-resident
        ],
        out_specs=(
            pl.BlockSpec((TB, LANE_W), lambda i: (i, 0)),              # dist (lane-dense)
            pl.BlockSpec((TB, PAD_ATOMS), lambda i: (i, 0)),           # q (lane-dense)
            pl.BlockSpec((TB, 1), lambda i: (i, 0)),                   # greedy action
        ),
        out_shape=(
            jax.ShapeDtypeStruct((Bp, LANE_W), jnp.float32),
            jax.ShapeDtypeStruct((Bp, PAD_ATOMS), jnp.float32),
            jax.ShapeDtypeStruct((Bp, 1), jnp.int32),
        ),
        compiler_params=pltpu.CompilerParams(
            dimension_semantics=("parallel",)),                        # megacore on v7x
    )(x, packed_params)

    dist = dist_flat.reshape(Bp, ACTION_DIM, PAD_ATOMS)[:B, :, :N_ATOMS]
    q = q128[:B, :ACTION_DIM]
    action = act[:B, 0]
    return dist, q, action


def xavier_uniform(key, fan_in, fan_out):
    bound = math.sqrt(6.0 / (fan_in + fan_out))
    # stored as (in, out) so the kernel does x @ W
    return jax.random.uniform(key, (fan_in, fan_out), jnp.float32, -bound, bound)


def make_params(key):
    k1, k2, k3 = jax.random.split(key, 3)
    w1 = xavier_uniform(k1, STATE_DIM, HIDDEN_DIM)
    b1 = jnp.zeros((HIDDEN_DIM,), jnp.float32)
    w2 = xavier_uniform(k2, HIDDEN_DIM, HIDDEN_DIM)
    b2 = jnp.zeros((HIDDEN_DIM,), jnp.float32)
    w3 = xavier_uniform(k3, HIDDEN_DIM, ACTION_DIM * N_ATOMS)
    b3 = jnp.zeros((ACTION_DIM * N_ATOMS,), jnp.float32)
    return (w1, b1, w2, b2, w3, b3)


def pack_params(params, support):
    """Host-side: lane-pad the head and pack params + support selector into one f32 buffer."""
    w1, b1, w2, b2, w3, b3 = params

    # Support padded to 128 lanes. Padded lanes MUST be exactly 0: padded dist lanes are
    # clamped to 0.001, and only a zero selector entry keeps them out of q.
    sup_pad = jnp.zeros((PAD_ATOMS,), jnp.float32).at[:N_ATOMS].set(support.astype(jnp.float32))

    w3_pad = jnp.zeros((HIDDEN_DIM, ACTION_DIM, PAD_ATOMS), jnp.float32)
    w3_pad = w3_pad.at[:, :, :N_ATOMS].set(w3.reshape(HIDDEN_DIM, ACTION_DIM, N_ATOMS))
    b3_pad = jnp.full((ACTION_DIM, PAD_ATOMS), NEG, jnp.float32)
    b3_pad = b3_pad.at[:, :N_ATOMS].set(b3.reshape(ACTION_DIM, N_ATOMS))

    # Block-diagonal support selector: sel[a*128 + j, a] = sup_pad[j].
    sel = jnp.zeros((ACTION_DIM, PAD_ATOMS, PAD_ATOMS), jnp.float32)
    for a in range(ACTION_DIM):
        sel = sel.at[a, :, a].set(sup_pad)
    sel = sel.reshape(LANE_W, PAD_ATOMS)

    pack = jnp.zeros((TOTAL_ROWS, LANE_W), jnp.float32)
    pack = pack.at[R_W1:R_W1 + STATE_DIM, :HIDDEN_DIM].set(w1)
    pack = pack.at[R_W2:R_W2 + HIDDEN_DIM, :HIDDEN_DIM].set(w2)
    pack = pack.at[R_W3:R_W3 + HIDDEN_DIM, :].set(w3_pad.reshape(HIDDEN_DIM, LANE_W))
    pack = pack.at[R_B1, :HIDDEN_DIM].set(b1)
    pack = pack.at[R_B2, :HIDDEN_DIM].set(b2)
    pack = pack.at[R_B3, :].set(b3_pad.reshape(LANE_W))
    pack = pack.at[R_SEL:R_SEL + LANE_W, :PAD_ATOMS].set(sel)
    return pack


def reference_forward(state, params, support):
    """Pure-JAX reference mirroring the PyTorch module."""
    w1, b1, w2, b2, w3, b3 = params
    x = state.astype(jnp.float32)
    h = jnp.maximum(x @ w1 + b1, 0.0)
    h = jnp.maximum(h @ w2 + b2, 0.0)
    logits = h @ w3 + b3
    dist = jax.nn.softmax(logits.reshape(x.shape[0], ACTION_DIM, N_ATOMS), axis=-1)
    dist = jnp.maximum(dist, 0.001)                       # clamp(min=0.001)
    q = jnp.sum(dist * support.reshape(1, 1, N_ATOMS), axis=2)
    return dist, q


if __name__ == "__main__":
    key = jax.random.PRNGKey(0)
    pkey, xkey = jax.random.split(key)

    params = make_params(pkey)
    support = jnp.linspace(VMIN, VMAX, N_ATOMS, dtype=jnp.float32)
    packed = pack_params(params, support)
    state = jax.random.normal(xkey, (BATCH, STATE_DIM), jnp.float32)

    fwd = jax.jit(lambda s, p: qnet_forward(s, p))
    dist, q, action = fwd(state, packed)
    jax.block_until_ready((dist, q, action))

    dist_ref, q_ref = reference_forward(state, params, support)
    action_ref = jnp.argmax(q_ref, axis=-1).astype(jnp.int32)

    assert dist.shape == (BATCH, ACTION_DIM, N_ATOMS)
    assert q.shape == (BATCH, ACTION_DIM)
    assert action.shape == (BATCH,)
    assert jnp.allclose(dist, dist_ref, atol=1e-5, rtol=1e-5)
    assert jnp.allclose(q, q_ref, atol=1e-3, rtol=1e-5)
    assert jnp.array_equal(action, action_ref)

    print("KERNEL_OK")
</pallas_src>

<mosaic_0001>
module attributes {stable_mosaic.version = 11 : i64} {
  func.func @qnet_kernel(%arg0: i32, %arg1: memref<8x16xf32, #tpu.memory_space<vmem>>, %arg2: memref<616x512xf32, #tpu.memory_space<vmem>>, %arg3: memref<8x512xf32, #tpu.memory_space<vmem>>, %arg4: memref<8x128xf32, #tpu.memory_space<vmem>>, %arg5: memref<8x1xi32, #tpu.memory_space<vmem>>) attributes {dimension_semantics = [#tpu.dimension_semantics<parallel>], iteration_bounds = array<i64: 1>, scalar_prefetch = 0 : i64, scratch_operands = 0 : i64, tpu.core_type = #tpu.core_type<tc>, window_params = [{transform_indices = @transform_0, window_bounds = array<i64: 8, 16>}, {pipeline_mode = #tpu.pipeline_mode<synchronous>, transform_indices = @transform_1, window_bounds = array<i64: 616, 512>}, {transform_indices = @transform_2, window_bounds = array<i64: 8, 512>}, {transform_indices = @transform_3, window_bounds = array<i64: 8, 128>}, {transform_indices = @transform_4, window_bounds = array<i64: 8, 1>}]} {
    %c0 = arith.constant 0 : index
    %c0_0 = arith.constant 0 : index
    %0 = vector.load %arg1[%c0, %c0_0] : memref<8x16xf32, #tpu.memory_space<vmem>>, vector<8x16xf32>
    %c0_1 = arith.constant 0 : index
    %c0_2 = arith.constant 0 : index
    %1 = vector.load %arg2[%c0_1, %c0_2] : memref<616x512xf32, #tpu.memory_space<vmem>>, vector<16x32xf32>
    %c80 = arith.constant 80 : index
    %c0_3 = arith.constant 0 : index
    %2 = vector.load %arg2[%c80, %c0_3] : memref<616x512xf32, #tpu.memory_space<vmem>>, vector<1x32xf32>
    %cst = arith.constant dense<0.000000e+00> : vector<8x32xf32>
    %3 = tpu.matmul %0, %1, %cst {dimension_numbers = #tpu.dot_dimension_numbers<[1], [0], [0], [1], [0, 0, 1, 1], [], []>} : vector<8x16xf32>, vector<16x32xf32>, vector<8x32xf32> -> vector<8x32xf32>
    %4 = vector.broadcast %2 : vector<1x32xf32> to vector<8x32xf32>
    %5 = arith.addf %3, %4 : vector<8x32xf32>
    %cst_4 = arith.constant 0.000000e+00 : f32
    %6 = vector.broadcast %cst_4 : f32 to vector<8x32xf32>
    %7 = arith.maximumf %5, %6 : vector<8x32xf32>
    %c16 = arith.constant 16 : index
    %c0_5 = arith.constant 0 : index
    %8 = vector.load %arg2[%c16, %c0_5] : memref<616x512xf32, #tpu.memory_space<vmem>>, vector<32x32xf32>
    %c88 = arith.constant 88 : index
    %c0_6 = arith.constant 0 : index
    %9 = vector.load %arg2[%c88, %c0_6] : memref<616x512xf32, #tpu.memory_space<vmem>>, vector<1x32xf32>
    %cst_7 = arith.constant dense<0.000000e+00> : vector<8x32xf32>
    %10 = tpu.matmul %7, %8, %cst_7 {dimension_numbers = #tpu.dot_dimension_numbers<[1], [0], [0], [1], [0, 0, 1, 1], [], []>} : vector<8x32xf32>, vector<32x32xf32>, vector<8x32xf32> -> vector<8x32xf32>
    %11 = vector.broadcast %9 : vector<1x32xf32> to vector<8x32xf32>
    %12 = arith.addf %10, %11 : vector<8x32xf32>
    %cst_8 = arith.constant 0.000000e+00 : f32
    %13 = vector.broadcast %cst_8 : f32 to vector<8x32xf32>
    %14 = arith.maximumf %12, %13 : vector<8x32xf32>
    %c48 = arith.constant 48 : index
    %c0_9 = arith.constant 0 : index
    %15 = vector.load %arg2[%c48, %c0_9] : memref<616x512xf32, #tpu.memory_space<vmem>>, vector<32x512xf32>
    %c96 = arith.constant 96 : index
    %c0_10 = arith.constant 0 : index
    %16 = vector.load %arg2[%c96, %c0_10] : memref<616x512xf32, #tpu.memory_space<vmem>>, vector<1x512xf32>
    %cst_11 = arith.constant dense<0.000000e+00> : vector<8x512xf32>
    %17 = tpu.matmul %14, %15, %cst_11 {dimension_numbers = #tpu.dot_dimension_numbers<[1], [0], [0], [1], [0, 0, 1, 1], [], []>} : vector<8x32xf32>, vector<32x512xf32>, vector<8x512xf32> -> vector<8x512xf32>
    %18 = vector.broadcast %16 : vector<1x512xf32> to vector<8x512xf32>
    %19 = arith.addf %17, %18 : vector<8x512xf32>
    %20 = vector.extract_strided_slice %19 {offsets = [0, 0], sizes = [8, 128], strides = [1, 1]} : vector<8x512xf32> to vector<8x128xf32>
    %cst_12 = arith.constant dense<0xFF800000> : vector<8xf32>
    %21 = vector.multi_reduction <maximumf>, %20, %cst_12 [1] : vector<8x128xf32> to vector<8xf32>
    %22 = vector.shape_cast %21 : vector<8xf32> to vector<8x1xf32>
    %23 = vector.broadcast %22 : vector<8x1xf32> to vector<8x128xf32>
    %24 = arith.subf %20, %23 : vector<8x128xf32>
    %25 = math.exp %24 : vector<8x128xf32>
    %cst_13 = arith.constant dense<0.000000e+00> : vector<8xf32>
    %26 = vector.multi_reduction <add>, %25, %cst_13 [1] : vector<8x128xf32> to vector<8xf32>
    %27 = vector.shape_cast %26 : vector<8xf32> to vector<8x1xf32>
    %cst_14 = arith.constant 1.000000e+00 : f32
    %28 = vector.broadcast %cst_14 : f32 to vector<8x1xf32>
    %29 = arith.divf %28, %27 : vector<8x1xf32>
    %30 = vector.broadcast %29 : vector<8x1xf32> to vector<8x128xf32>
    %31 = arith.mulf %25, %30 : vector<8x128xf32>
    %cst_15 = arith.constant 1.000000e-03 : f32
    %32 = vector.broadcast %cst_15 : f32 to vector<8x128xf32>
    %33 = arith.maximumf %31, %32 : vector<8x128xf32>
    %34 = vector.extract_strided_slice %19 {offsets = [0, 128], sizes = [8, 128], strides = [1, 1]} : vector<8x512xf32> to vector<8x128xf32>
    %cst_16 = arith.constant dense<0xFF800000> : vector<8xf32>
    %35 = vector.multi_reduction <maximumf>, %34, %cst_16 [1] : vector<8x128xf32> to vector<8xf32>
    %36 = vector.shape_cast %35 : vector<8xf32> to vector<8x1xf32>
    %37 = vector.broadcast %36 : vector<8x1xf32> to vector<8x128xf32>
    %38 = arith.subf %34, %37 : vector<8x128xf32>
    %39 = math.exp %38 : vector<8x128xf32>
    %cst_17 = arith.constant dense<0.000000e+00> : vector<8xf32>
    %40 = vector.multi_reduction <add>, %39, %cst_17 [1] : vector<8x128xf32> to vector<8xf32>
    %41 = vector.shape_cast %40 : vector<8xf32> to vector<8x1xf32>
    %cst_18 = arith.constant 1.000000e+00 : f32
    %42 = vector.broadcast %cst_18 : f32 to vector<8x1xf32>
    %43 = arith.divf %42, %41 : vector<8x1xf32>
    %44 = vector.broadcast %43 : vector<8x1xf32> to vector<8x128xf32>
    %45 = arith.mulf %39, %44 : vector<8x128xf32>
    %cst_19 = arith.constant 1.000000e-03 : f32
    %46 = vector.broadcast %cst_19 : f32 to vector<8x128xf32>
    %47 = arith.maximumf %45, %46 : vector<8x128xf32>
    %48 = vector.extract_strided_slice %19 {offsets = [0, 256], sizes = [8, 128], strides = [1, 1]} : vector<8x512xf32> to vector<8x128xf32>
    %cst_20 = arith.constant dense<0xFF800000> : vector<8xf32>
    %49 = vector.multi_reduction <maximumf>, %48, %cst_20 [1] : vector<8x128xf32> to vector<8xf32>
    %50 = vector.shape_cast %49 : vector<8xf32> to vector<8x1xf32>
    %51 = vector.broadcast %50 : vector<8x1xf32> to vector<8x128xf32>
    %52 = arith.subf %48, %51 : vector<8x128xf32>
    %53 = math.exp %52 : vector<8x128xf32>
    %cst_21 = arith.constant dense<0.000000e+00> : vector<8xf32>
    %54 = vector.multi_reduction <add>, %53, %cst_21 [1] : vector<8x128xf32> to vector<8xf32>
    %55 = vector.shape_cast %54 : vector<8xf32> to vector<8x1xf32>
    %cst_22 = arith.constant 1.000000e+00 : f32
    %56 = vector.broadcast %cst_22 : f32 to vector<8x1xf32>
    %57 = arith.divf %56, %55 : vector<8x1xf32>
    %58 = vector.broadcast %57 : vector<8x1xf32> to vector<8x128xf32>
    %59 = arith.mulf %53, %58 : vector<8x128xf32>
    %cst_23 = arith.constant 1.000000e-03 : f32
    %60 = vector.broadcast %cst_23 : f32 to vector<8x128xf32>
    %61 = arith.maximumf %59, %60 : vector<8x128xf32>
    %62 = vector.extract_strided_slice %19 {offsets = [0, 384], sizes = [8, 128], strides = [1, 1]} : vector<8x512xf32> to vector<8x128xf32>
    %cst_24 = arith.constant dense<0xFF800000> : vector<8xf32>
    %63 = vector.multi_reduction <maximumf>, %62, %cst_24 [1] : vector<8x128xf32> to vector<8xf32>
    %64 = vector.shape_cast %63 : vector<8xf32> to vector<8x1xf32>
    %65 = vector.broadcast %64 : vector<8x1xf32> to vector<8x128xf32>
    %66 = arith.subf %62, %65 : vector<8x128xf32>
    %67 = math.exp %66 : vector<8x128xf32>
    %cst_25 = arith.constant dense<0.000000e+00> : vector<8xf32>
    %68 = vector.multi_reduction <add>, %67, %cst_25 [1] : vector<8x128xf32> to vector<8xf32>
    %69 = vector.shape_cast %68 : vector<8xf32> to vector<8x1xf32>
    %cst_26 = arith.constant 1.000000e+00 : f32
    %70 = vector.broadcast %cst_26 : f32 to vector<8x1xf32>
    %71 = arith.divf %70, %69 : vector<8x1xf32>
    %72 = vector.broadcast %71 : vector<8x1xf32> to vector<8x128xf32>
    %73 = arith.mulf %67, %72 : vector<8x128xf32>
    %cst_27 = arith.constant 1.000000e-03 : f32
    %74 = vector.broadcast %cst_27 : f32 to vector<8x128xf32>
    %75 = arith.maximumf %73, %74 : vector<8x128xf32>
    %76 = tpu.concatenate %33, %47, %61, %75 in 1 : vector<8x128xf32>, vector<8x128xf32>, vector<8x128xf32>, vector<8x128xf32> -> vector<8x512xf32>
    %c0_28 = arith.constant 0 : index
    %c0_29 = arith.constant 0 : index
    %77 = vector.load %arg3[%c0_28, %c0_29] : memref<8x512xf32, #tpu.memory_space<vmem>>, vector<8x512xf32>
    tpu.vector_store %arg3[%c0_28, %c0_29], %76 {strides = array<i32>} : memref<8x512xf32, #tpu.memory_space<vmem>>, vector<8x512xf32>,
    %c104 = arith.constant 104 : index
    %c0_30 = arith.constant 0 : index
    %78 = vector.load %arg2[%c104, %c0_30] : memref<616x512xf32, #tpu.memory_space<vmem>>, vector<512x128xf32>
    %cst_31 = arith.constant dense<0.000000e+00> : vector<8x128xf32>
    %79 = tpu.matmul %76, %78, %cst_31 {dimension_numbers = #tpu.dot_dimension_numbers<[1], [0], [0], [1], [0, 0, 1, 1], [], []>} : vector<8x512xf32>, vector<512x128xf32>, vector<8x128xf32> -> vector<8x128xf32>
    %c0_32 = arith.constant 0 : index
    %c0_33 = arith.constant 0 : index
    %80 = vector.load %arg4[%c0_32, %c0_33] : memref<8x128xf32, #tpu.memory_space<vmem>>, vector<8x128xf32>
    tpu.vector_store %arg4[%c0_32, %c0_33], %79 {strides = array<i32>} : memref<8x128xf32, #tpu.memory_space<vmem>>, vector<8x128xf32>,
    %81 = tpu.iota {dimensions = array<i32: 1>} : vector<8x128xi32>
    %c4_i32 = arith.constant 4 : i32
    %82 = vector.broadcast %c4_i32 : i32 to vector<8x128xi32>
    %83 = arith.cmpi slt, %81, %82 : vector<8x128xi32>
    %cst_34 = arith.constant 0xFF800000 : f32
    %84 = vector.broadcast %cst_34 : f32 to vector<8x128xf32>
    %85 = arith.select %83, %79, %84 : vector<8x128xi1>, vector<8x128xf32>
    %cst_35 = arith.constant dense<0xFF800000> : vector<8xf32>
    %86 = vector.multi_reduction <maximumf>, %85, %cst_35 [1] : vector<8x128xf32> to vector<8xf32>
    %87 = vector.shape_cast %86 : vector<8xf32> to vector<8x1xf32>
    %88 = vector.broadcast %87 : vector<8x1xf32> to vector<8x128xf32>
    %89 = arith.cmpf oeq, %85, %88 : vector<8x128xf32>
    %c128_i32 = arith.constant 128 : i32
    %90 = vector.broadcast %c128_i32 : i32 to vector<8x128xi32>
    %91 = arith.select %89, %81, %90 : vector<8x128xi1>, vector<8x128xi32>
    %cst_36 = arith.constant dense<2147483647> : vector<8xi32>
    %92 = vector.multi_reduction <minsi>, %91, %cst_36 [1] : vector<8x128xi32> to vector<8xi32>
    %93 = vector.shape_cast %92 : vector<8xi32> to vector<8x1xi32>
    %c0_37 = arith.constant 0 : index
    %c0_38 = arith.constant 0 : index
    %94 = vector.load %arg5[%c0_37, %c0_38] : memref<8x1xi32, #tpu.memory_space<vmem>>, vector<8x1xi32>
    tpu.vector_store %arg5[%c0_37, %c0_38], %93 {strides = array<i32>} : memref<8x1xi32, #tpu.memory_space<vmem>>, vector<8x1xi32>,
    return
  }
  func.func @transform_0(%arg0: i32) -> (i32, i32) {
    %c0_i32 = arith.constant 0 : i32
    %c0_i32_0 = arith.constant 0 : i32
    return %arg0, %c0_i32 : i32, i32
  }
  func.func @transform_1(%arg0: i32) -> (i32, i32) {
    %c0_i32 = arith.constant 0 : i32
    %c0_i32_0 = arith.constant 0 : i32
    %c0_i32_1 = arith.constant 0 : i32
    return %c0_i32, %c0_i32_0 : i32, i32
  }
  func.func @transform_2(%arg0: i32) -> (i32, i32) {
    %c0_i32 = arith.constant 0 : i32
    %c0_i32_0 = arith.constant 0 : i32
    return %arg0, %c0_i32 : i32, i32
  }
  func.func @transform_3(%arg0: i32) -> (i32, i32) {
    %c0_i32 = arith.constant 0 : i32
    %c0_i32_0 = arith.constant 0 : i32
    return %arg0, %c0_i32 : i32, i32
  }
  func.func @transform_4(%arg0: i32) -> (i32, i32) {
    %c0_i32 = arith.constant 0 : i32
    %c0_i32_0 = arith.constant 0 : i32
    return %arg0, %c0_i32 : i32, i32
  }
}

</mosaic_0001>

<bundles_post_ra>
// kernel: _lambda_.1
= control target key start
LH: loop header
LB: loop body
LE: loop exit
PB: predicated region body
PF: predicated region fallthrough
CT: control target
= control target key end

     0   :  { %10 = vsyncpa [#allocation3], 0  ;;  %s896_s15 = smov [#allocation2]   ;;  %s989_s0 = inlined_call_operand.vmem [shape: f32[8,16], index: 0, kind: input, shape index: {}]   ;;  %s990_s1 = inlined_call_operand.hbm [shape: f32[616,512], index: 1, kind: input, shape index: {}]   ;;  %s991_s2 = inlined_call_operand.vmem [shape: f32[8,512], index: 2, kind: output, shape index: {0}]   ;;  %s992_s3 = inlined_call_operand.vmem [shape: f32[8,128], index: 3, kind: output, shape index: {1}]   ;;  %s993_s4 = inlined_call_operand.vmem [shape: s32[8,1], index: 4, kind: output, shape index: {2}]  }
   0x1   :  { %s18_s16 = sshll.u32 %s896_s15, 4  ;;  %s872_s19 = scalar_lea.hbm %s990_s1, 39424  ;;  %s19_s16 = int_to_ptr.vmem [resolvable:$true] %s18_s16 }
   0x2   :  { %p873_p0 = scmp.ne.s32.totalorder %s990_s1, %s872_s19  ;;  %p876_p1 = scmp.lt.u32.totalorder %s872_s19, %s990_s1 }
   0x4   :  { %p878_p2 = pnand %p876_p1, %p873_p0 }
   0x6   :  { %881 = shalt.err (!%p878_p2)
}
   0x7   :  { %s882_s24 = scalar_lea.vmem %s19_s16, 39424  ;;  %p887_p4 = scmp.lt.s32.totalorder %s19_s16, %s19_s16 }
   0x8   :  { %p883_p3 = scmp.ne.s32.totalorder %s19_s16, %s882_s24  ;;  %p888_p5 = scmp.lt.s32.totalorder %s882_s24, %s882_s24 }
   0xa   :  { %p889_p6 = por %p888_p5, %p887_p4 }
   0xc   :  { %p890_p7 = pnand %p889_p6, %p883_p3 }
   0xe   :  { %893 = shalt.err (!%p890_p7)
}
   0xf   :  { %s897_s25 = smov 512   ;;  %s898_s26 = smov 32  }
  0x10   :  { %24 = dma.hbm_to_vmem [thread:$0]  %s990_s1, 39424, %s19_s16, [#allocation3], %s897_s25, %s897_s25, %s898_s26  }
  0x11   :  { %894 = dma.done.wait [#allocation3], 39424  }
  0x12   :  { %895 = vsyncadd [#allocation3], 4294927872  ;;  %v899_v0 = vmov 0.0|0.0   ;;  %vm900_vm0 = vmmov 0   ;;  %v901_v1 = vmov 0.0   ;;  %v29_v2 = vld [vmem:[#allocation2] sm:$0xff]  ;;  %v206_v46 = vlaneseq }
  0x13   :  { %761 = vmatprep.subr.bf16.mxu0 %v899_v0  ;;  %747 = vmatprep.mubr.msk.f32.mxu0 %vm900_vm0, %v901_v1  ;;  %v30_v3 = vld [vmem:[#allocation2 + $0x20] sm:$0xff]  ;;  %vm32_vm1 = vcmask 130048   ;;  %v188_v12 = vld [vmem:[#allocation2 + $0xc8] sm:$0xff]  ;;  %v190_v14 = vld [vmem:[#allocation2 + $0xd8] sm:$0xff]  ;;  %vm112_vm2 = vcmask 261120   ;;  %vm646_vm6 = vcmask 7168  }
  0x14   :  { %764 = vmatprep.subr.bf16.mxu1 %v899_v0  ;;  %758 = vmatprep.mubr.msk.f32.mxu1 %vm900_vm0, %v901_v1  ;;  %v762_v4 = vpack.c.bf16 %v30_v3, %v29_v2  ;;  %v107_v5 = vld [vmem:[#allocation2 + $0x40] sm:$0xff]  ;;  %v192_v13 = vld [vmem:[#allocation2 + $0xe8] sm:$0xff]  ;;  %v194_v16 = vld [vmem:[#allocation2 + $0xf8] sm:$0xff]  ;;  %v207_v47 = vshrl.u32 %v206_v46, 7 }
  0x15   :  { %v108_v6 = vld [vmem:[#allocation2 + $0x60] sm:$0xff]  ;;  %v770_v15 = vpack.c.bf16 %v192_v13, %v188_v12  ;;  %v778_v19 = vpack.c.bf16 %v194_v16, %v190_v14  ;;  %v189_v22 = vld [vmem:[#allocation2 + $0xd0] sm:$0xff]  ;;  %v196_v29 = vld [vmem:[#allocation2 + $0x108] sm:$0xff] }
  0x16   :  { %v765_v7 = vpack.c.bf16 %v108_v6, %v107_v5  ;;  %763 = vmatpush3.bf16.msra.mxu0 %v762_v4  ;;  %v28_v8 = vld [vmem:[%s989_s0] sm:$0xff]  ;;  %v193_v23 = vld [vmem:[#allocation2 + $0xf0] sm:$0xff]  ;;  %v200_v30 = vld [vmem:[#allocation2 + $0x128] sm:$0xff]  ;;  %v208_v48 = vsub.s32 0, %v207_v47  ;;  %v212_v50 = vsub.s32 1, %v207_v47  ;;  %v216_v52 = vsub.s32 2, %v207_v47 }
  0x17   :  { %v109_v9 = vld [vmem:[#allocation2 + $0x80] sm:$0xff]  ;;  %771 = vmatprep.subr.bf16.mxu0 %v770_v15  ;;  %v780_v27 = vpack.c.bf16 %v193_v23, %v189_v22  ;;  %v198_v31 = vld [vmem:[#allocation2 + $0x118] sm:$0xff]  ;;  %v774_v32 = vpack.c.bf16 %v200_v30, %v196_v29  ;;  %v197_v38 = vld [vmem:[#allocation2 + $0x110] sm:$0xff]  ;;  %v220_v54 = vsub.s32 3, %v207_v47 }
  0x18   :  { %766 = vmatpush3.bf16.msra.mxu1 %v765_v7  ;;  %v110_v10 = vld [vmem:[#allocation2 + $0xa0] sm:$0xff]  ;;  %v202_v33 = vld [vmem:[#allocation2 + $0x138] sm:$0xff]  ;;  %v201_v39 = vld [vmem:[#allocation2 + $0x130] sm:$0xff] }
  0x19   :  { %767 = vmatprep.subr.bf16.mxu1 %v899_v0  ;;  %748 = vmatmul.mubr.msk.f32.vlgmr.msra.gmra.mrb[0].mxu0 %vm32_vm1, %v28_v8  ;;  %v768_v11 = vpack.c.bf16 %v110_v10, %v109_v9  ;;  %v187_v17 = vld [vmem:[#allocation2 + $0xc0] sm:$0xff]  ;;  %v782_v36 = vpack.c.bf16 %v202_v33, %v198_v31  ;;  %v784_v40 = vpack.c.bf16 %v201_v39, %v197_v38 }
  0x1a   :  { %293 = vmatprep.mubr.f32.mxu0 %v901_v1  ;;  %v191_v18 = vld [vmem:[#allocation2 + $0xe0] sm:$0xff] }
  0x1b   :  { %v772_v20 = vpack.c.bf16 %v191_v18, %v187_v17  ;;  %v31_v21 = vld [vmem:[#allocation2 + $0x140] ss:$0 sm:$0xff] }
  0x1c   :  { %769 = vmatpush3.bf16.msra.mxu1 %v768_v11  ;;  %v195_v34 = vld [vmem:[#allocation2 + $0x100] sm:$0xff] }
  0x1d   :  { %779 = vmatprep.subr.bf16.mxu1 %v778_v19  ;;  %773 = vmatpush1.bf16.msra.mxu0 %v772_v20  ;;  %v199_v35 = vld [vmem:[#allocation2 + $0x120] sm:$0xff] }
  0x1e   :  { %v776_v37 = vpack.c.bf16 %v199_v35, %v195_v34  ;;  %775 = vmatprep.subr.bf16.mxu0 %v774_v32  ;;  %v111_v41 = vld [vmem:[#allocation2 + $0x160] ss:$0 sm:$0xff] }
  0x1f   :  { %v204_v49 = vld [vmem:[#allocation2 + $0x180] ss:$8 sm:$0xf] }
  0x20   :  { %v209_v51 = vrot.slane %v204_v49, %v208_v48  ;;  %v213_v53 = vrot.slane %v204_v49, %v212_v50  ;;  %v217_v58 = vrot.slane %v204_v49, %v216_v52  ;;  %v221_v62 = vrot.slane %v204_v49, %v220_v54  ;;  %v436_v2 = vld [vmem:[#allocation2 + $0x3c0] sm:$0xff] }
  0x21   :  { %777 = vmatpush1.bf16.msra.mxu0 %v776_v37  ;;  %v419_v3 = vld [vmem:[#allocation2 + $0x1a0] sm:$0xff] }
  0x22   :  { %v420_v5 = vld [vmem:[#allocation2 + $0x1c0] sm:$0xff] }
  0x23   :  { %v437_v6 = vld [vmem:[#allocation2 + $0x3e0] sm:$0xff]  ;;  %v788_v8 = vpack.c.bf16 %v420_v5, %v419_v3 }
  0x24   :  { %v438_v7 = vld [vmem:[#allocation2 + $0x400] sm:$0xff] }
  0x25   :  { %v790_v9 = vpack.c.bf16 %v438_v7, %v437_v6  ;;  %v467_v10 = vld [vmem:[#allocation2 + $0x7a0] sm:$0xff] }
  0x26   :  { %v468_v11 = vld [vmem:[#allocation2 + $0x7c0] sm:$0xff] }
  0x27   :  { %v421_v12 = vld [vmem:[#allocation2 + $0x1e0] sm:$0xff]  ;;  %v818_v13 = vpack.c.bf16 %v468_v11, %v467_v10 }
  0x28   :  { %v422_v14 = vld [vmem:[#allocation2 + $0x200] sm:$0xff] }
  0x29   :  { %v451_v15 = vld [vmem:[#allocation2 + $0x5a0] sm:$0xff]  ;;  %v792_v17 = vpack.c.bf16 %v422_v14, %v421_v12 }
  0x2a   :  { %v452_v16 = vld [vmem:[#allocation2 + $0x5c0] sm:$0xff] }
  0x2b   :  { %v820_v18 = vpack.c.bf16 %v452_v16, %v451_v15  ;;  %v439_v19 = vld [vmem:[#allocation2 + $0x420] sm:$0xff] }
  0x2c   :  { %v440_v20 = vld [vmem:[#allocation2 + $0x440] sm:$0xff] }
  0x2d   :  { %v794_v22 = vpack.c.bf16 %v440_v20, %v439_v19  ;;  %v470_v23 = vld [vmem:[#allocation2 + $0x800] sm:$0xff] }
  0x2e   :  { %v441_v29 = vld [vmem:[#allocation2 + $0x460] sm:$0xff] }
  0x2f   :  { %v442_v31 = vld [vmem:[#allocation2 + $0x480] sm:$0xff] }
  0x30   :  { %v471_v32 = vld [vmem:[#allocation2 + $0x820] sm:$0xff] }
  0x31   :  { %v472_v33 = vld [vmem:[#allocation2 + $0x840] sm:$0xff] }
  0x32   :  { %v826_v35 = vpack.c.bf16 %v472_v33, %v471_v32  ;;  %v425_v54 = vld [vmem:[#allocation2 + $0x260] sm:$0xff] }
  0x33   :  { %v428_v3 = vld [vmem:[#allocation2 + $0x2c0] sm:$0xff] }
  0x34   :  { %v458_v6 = vld [vmem:[#allocation2 + $0x680] sm:$0xff] }
  0x35   :  { %v475_v10 = vld [vmem:[#allocation2 + $0x8a0] sm:$0xff] }
  0x36   :  { %v476_v12 = vld [vmem:[#allocation2 + $0x8c0] sm:$0xff] }
  0x37   :  { %v430_v14 = vld [vmem:[#allocation2 + $0x300] sm:$0xff]  ;;  %v834_v15 = vpack.c.bf16 %v476_v12, %v475_v10 }
  0x38   :  { %v447_v20 = vld [vmem:[#allocation2 + $0x520] sm:$0xff] }
  0x39   :  { %v450_v33 = vld [vmem:[#allocation2 + $0x580] sm:$0xff] }
  0xec   :  { %v102_v24 = vpop.f32.mrb[0].mxu0 }
  0xed   :  { %v103_v25 = vadd.f32 %v102_v24, %v31_v21  ;;  %v749_v26 = vpop.f32.mrb[1].mxu0  ;;  %v469_v21 = vld [vmem:[#allocation2 + $0x7e0] sm:$0xff] }
  0xee   :  { %v423_v24 = vld [vmem:[#allocation2 + $0x220] sm:$0xff]  ;;  %v822_v26 = vpack.c.bf16 %v470_v23, %v469_v21 }
  0xef   :  { %v106_v28 = vmax.f32 %v103_v25, 0.0  ;;  %v424_v25 = vld [vmem:[#allocation2 + $0x240] sm:$0xff] }
  0xf0   :  { %v796_v34 = vpack.c.bf16 %v424_v25, %v423_v24  ;;  %v448_v21 = vld [vmem:[#allocation2 + $0x540] sm:$0xff] }
  0xf1   :  { %759 = vmatmul.mubr.msk.f32.vlgmr.msra.gmra.mrb[0].mxu1 %vm112_vm2, %v106_v28  ;;  %v454_v28 = vld [vmem:[#allocation2 + $0x600] sm:$0xff]  ;;  %v810_v23 = vpack.c.bf16 %v448_v21, %v447_v20 }
  0xf2   :  { %781 = vmatpush1.bf16.msra.mxu1 %v780_v27  ;;  %364 = vmatprep.mubr.f32.mxu1 %v901_v1  ;;  %v435_v1 = vld [vmem:[#allocation2 + $0x3a0] sm:$0xff] }
  0xf3   :  { %783 = vmatprep.subr.bf16.mxu1 %v782_v36  ;;  %v786_v4 = vpack.c.bf16 %v436_v2, %v435_v1  ;;  %v453_v27 = vld [vmem:[#allocation2 + $0x5e0] sm:$0xff]  ;;  %v798_v36 = vpack.c.bf16 %v442_v31, %v441_v29 }
  0xf4   :  { %v824_v30 = vpack.c.bf16 %v454_v28, %v453_v27  ;;  %v427_v2 = vld [vmem:[#allocation2 + $0x2a0] sm:$0xff] }
  0xf5   :  { %787 = vmatprep.subr.bf16.mxu0 %v786_v4  ;;  %v457_v4 = vld [vmem:[#allocation2 + $0x660] sm:$0xff]  ;;  %v804_v5 = vpack.c.bf16 %v428_v3, %v427_v2 }
  0xf6   :  { %785 = vmatpush1.bf16.msra.mxu1 %v784_v40  ;;  %v832_v7 = vpack.c.bf16 %v458_v6, %v457_v4  ;;  %v478_v24 = vld [vmem:[#allocation2 + $0x900] sm:$0xff] }
  0xf7   :  { %819 = vmatprep.subr.bf16.mxu1 %v818_v13  ;;  %v429_v13 = vld [vmem:[#allocation2 + $0x2e0] sm:$0xff] }
  0xf8   :  { %v808_v16 = vpack.c.bf16 %v430_v14, %v429_v13  ;;  %v431_v25 = vld [vmem:[#allocation2 + $0x320] sm:$0xff] }
  0xf9   :  { %v461_v29 = vld [vmem:[#allocation2 + $0x6e0] sm:$0xff] }
  0xfa   :  { %v449_v31 = vld [vmem:[#allocation2 + $0x560] sm:$0xff] }
 0x1c4   :  { %v182_v42 = vpop.f32.mrb[0].mxu1 }
 0x1c5   :  { %v183_v43 = vadd.f32 %v182_v42, %v111_v41  ;;  %v760_v44 = vpop.f32.mrb[1].mxu1 }
 0x1c7   :  { %v186_v45 = vmax.f32 %v183_v43, 0.0 }
 0x1c9   :  { %663 = vmatmul.mubr.msk.f32.vlgmr.msra.gmra.mrb[2].mxu0 %vm112_vm2, %v186_v45  ;;  %664 = vmatmul.mubr.msk.f32.vlgmr.msra.gmra.mrb[2].mxu1 %vm112_vm2, %v186_v45 }
 0x1ca   :  { %789 = vmatpush3.bf16.msra.mxu0 %v788_v8  ;;  %821 = vmatpush3.bf16.msra.mxu1 %v820_v18  ;;  %v445_v8 = vld [vmem:[#allocation2 + $0x4e0] sm:$0xff] }
 0x1cb   :  { %791 = vmatprep.subr.bf16.mxu0 %v790_v9  ;;  %823 = vmatprep.subr.bf16.mxu1 %v822_v26  ;;  %v446_v9 = vld [vmem:[#allocation2 + $0x500] sm:$0xff] }
 0x1cc   :  { %v806_v11 = vpack.c.bf16 %v446_v9, %v445_v8  ;;  %v460_v18 = vld [vmem:[#allocation2 + $0x6c0] sm:$0xff] }
 0x1cd   :  { %v432_v26 = vld [vmem:[#allocation2 + $0x340] sm:$0xff] }
 0x1ce   :  { %793 = vmatpush3.bf16.msra.mxu0 %v792_v17  ;;  %825 = vmatpush3.bf16.msra.mxu1 %v824_v30  ;;  %v459_v17 = vld [vmem:[#allocation2 + $0x6a0] sm:$0xff]  ;;  %v812_v28 = vpack.c.bf16 %v432_v26, %v431_v25 }
 0x1cf   :  { %795 = vmatprep.subr.bf16.mxu0 %v794_v22  ;;  %827 = vmatprep.subr.bf16.mxu1 %v826_v35  ;;  %v836_v19 = vpack.c.bf16 %v460_v18, %v459_v17  ;;  %v477_v22 = vld [vmem:[#allocation2 + $0x8e0] sm:$0xff] }
 0x1d0   :  { %v838_v27 = vpack.c.bf16 %v478_v24, %v477_v22  ;;  %v462_v30 = vld [vmem:[#allocation2 + $0x700] sm:$0xff] }
 0x1d1   :  { %v840_v32 = vpack.c.bf16 %v462_v30, %v461_v29  ;;  %v479_v35 = vld [vmem:[#allocation2 + $0x920] sm:$0xff] }
 0x1d2   :  { %797 = vmatpush3.bf16.msra.mxu0 %v796_v34  ;;  %v814_v34 = vpack.c.bf16 %v450_v33, %v449_v31 }
 0x1d3   :  { %799 = vmatprep.subr.bf16.mxu0 %v798_v36  ;;  %v480_v36 = vld [vmem:[#allocation2 + $0x940] sm:$0xff] }
 0x29c   :  { %v295_v55 = vpop.f32.mrb[2].mxu0  ;;  %v366_v56 = vpop.f32.mrb[2].mxu1 }
 0x29d   :  { %v946_v57 = vadd.f32 %v295_v55, %v209_v51  ;;  %v297_v59 = vpop.f32.mrb[3].mxu0  ;;  %v368_v60 = vpop.f32.mrb[3].mxu1  ;;  %v949_v63 = vadd.f32 %v366_v56, %v217_v58  ;;  %v426_v55 = vld [vmem:[#allocation2 + $0x280] sm:$0xff] }
 0x29e   :  { %v298_v61 = vadd.f32 %v297_v59, %v213_v53  ;;  %v369_v0 = vadd.f32 %v368_v60, %v221_v62  ;;  %v455_v56 = vld [vmem:[#allocation2 + $0x620] sm:$0xff] }
 0x29f   :  { %371 = vmax.xlane.f32.xlu1 %v946_v57  ;;  %v456_v58 = vld [vmem:[#allocation2 + $0x640] sm:$0xff] }
 0x2a0   :  { %382 = vmax.xlane.f32.xlu0 %v298_v61  ;;  %v828_v59 = vpack.c.bf16 %v456_v58, %v455_v56  ;;  %v443_v60 = vld [vmem:[#allocation2 + $0x4a0] sm:$0xff] }
 0x2a1   :  { %v473_v62 = vld [vmem:[#allocation2 + $0x860] sm:$0xff] }
 0x2a2   :  { %829 = vmatpush3.bf16.msra.mxu1 %v828_v59 }
 0x2a3   :  { %393 = vmax.xlane.f32.xlu1 %v949_v63 }
 0x2a4   :  { %404 = vmax.xlane.f32.xlu0 %v369_v0 }
 0x32c   :  { %v372_v37 = vpop.xlane.xlu1 %371 }
 0x32d   :  { %v373_v38 = vsub.f32 %v946_v57, %v372_v37  ;;  %v383_v39 = vpop.xlane.xlu0 %382  ;;  %v800_v57 = vpack.c.bf16 %v426_v55, %v425_v54  ;;  %v842_v37 = vpack.c.bf16 %v480_v36, %v479_v35 }
 0x32e   :  { %v384_v40 = vsub.f32 %v298_v61, %v383_v39  ;;  %v444_v61 = vld [vmem:[#allocation2 + $0x4c0] sm:$0xff] }
 0x32f   :  { %v374_v43 = vmul.f32 1.442695, %v373_v38  ;;  %801 = vmatpush3.bf16.msra.mxu0 %v800_v57  ;;  %v433_v38 = vld [vmem:[#allocation2 + $0x360] sm:$0xff] }
 0x330   :  { %v385_v41 = vmul.f32 1.442695, %v384_v40  ;;  %v394_v42 = vpop.xlane.xlu1 %393  ;;  %v434_v39 = vld [vmem:[#allocation2 + $0x380] sm:$0xff] }
 0x331   :  { %v405_v44 = vpop.xlane.xlu0 %404  ;;  %v395_v45 = vsub.f32 %v949_v63, %v394_v42  ;;  %v802_v63 = vpack.c.bf16 %v444_v61, %v443_v60  ;;  %v463_v40 = vld [vmem:[#allocation2 + $0x720] sm:$0xff] }
 0x332   :  { %856 = vpow2.f32 %v385_v41  ;;  %v406_v47 = vsub.f32 %v369_v0, %v405_v44  ;;  %v474_v0 = vld [vmem:[#allocation2 + $0x880] sm:$0xff]  ;;  %v816_v41 = vpack.c.bf16 %v434_v39, %v433_v38 }
 0x333   :  { %858 = vpow2.f32 %v374_v43  ;;  %v396_v49 = vmul.f32 1.442695, %v395_v45  ;;  %v830_v1 = vpack.c.bf16 %v474_v0, %v473_v62  ;;  %803 = vmatprep.subr.bf16.mxu0 %v802_v63  ;;  %v464_v42 = vld [vmem:[#allocation2 + $0x740] sm:$0xff] }
 0x334   :  { %v407_v48 = vmul.f32 1.442695, %v406_v47  ;;  %805 = vmatpush3.bf16.msra.mxu0 %v804_v5  ;;  %v844_v43 = vpack.c.bf16 %v464_v42, %v463_v40  ;;  %v481_v44 = vld [vmem:[#allocation2 + $0x960] sm:$0xff] }
 0x335   :  { %831 = vmatprep.subr.bf16.mxu1 %v830_v1  ;;  %807 = vmatprep.subr.bf16.mxu0 %v806_v11  ;;  %v482_v45 = vld [vmem:[#allocation2 + $0x980] sm:$0xff] }
 0x336   :  { %860 = vpow2.f32 %v407_v48  ;;  %833 = vmatpush3.bf16.msra.mxu1 %v832_v7  ;;  %v846_v47 = vpack.c.bf16 %v482_v45, %v481_v44  ;;  %v465_v48 = vld [vmem:[#allocation2 + $0x760] sm:$0xff]  ;;  %v625_v7 = vand.u32 127, %v206_v46 }
 0x337   :  { %862 = vpow2.f32 %v396_v49  ;;  %835 = vmatprep.subr.bf16.mxu1 %v834_v15  ;;  %v466_v49 = vld [vmem:[#allocation2 + $0x780] sm:$0xff] }
 0x338   :  { %809 = vmatpush3.bf16.msra.mxu0 %v808_v16  ;;  %v848_v54 = vpack.c.bf16 %v466_v49, %v465_v48  ;;  %vm626_vm3 = vcmp.lt.s32.totalorder %v625_v7, 4 }
 0x339   :  { %811 = vmatprep.subr.bf16.mxu0 %v810_v23 }
 0x33a   :  { %837 = vmatpush3.bf16.msra.mxu1 %v836_v19 }
 0x33b   :  { %839 = vmatprep.subr.bf16.mxu1 %v838_v27 }
 0x33c   :  { %v954_v50 = vpop.eup %856  ;;  %813 = vmatpush3.bf16.msra.mxu0 %v812_v28 }
 0x33d   :  { %387 = vadd.xlane.f32.xlu0 %v954_v50  ;;  %v957_v51 = vpop.eup %858  ;;  %815 = vmatprep.subr.bf16.mxu0 %v814_v34 }
 0x33e   :  { %841 = vmatpush3.bf16.msra.mxu1 %v840_v32 }
 0x33f   :  { %843 = vmatprep.subr.bf16.mxu1 %v842_v37 }
 0x340   :  { %v959_v52 = vpop.eup %860  ;;  %817 = vmatpush3.bf16.msra.mxu0 %v816_v41 }
 0x341   :  { %409 = vadd.xlane.f32.xlu1 %v959_v52  ;;  %376 = vadd.xlane.f32.xlu0 %v957_v51  ;;  %v963_v53 = vpop.eup %862 }
 0x342   :  { %845 = vmatpush3.bf16.msra.mxu1 %v844_v43 }
 0x343   :  { %847 = vmatprep.subr.bf16.mxu1 %v846_v47 }
 0x345   :  { %398 = vadd.xlane.f32.xlu1 %v963_v53 }
 0x346   :  { %849 = vmatpush3.bf16.msra.mxu1 %v848_v54 }
 0x3ca   :  { %v388_v55 = vpop.xlane.xlu0 %387 }
 0x3cb   :  { %864 = vrcp.f32 %v388_v55 }
 0x3ce   :  { %v377_v56 = vpop.xlane.xlu0 %376  ;;  %v410_v57 = vpop.xlane.xlu1 %409 }
 0x3cf   :  { %866 = vrcp.f32 %v377_v56 }
 0x3d0   :  { %868 = vrcp.f32 %v410_v57 }
 0x3d2   :  { %v399_v58 = vpop.xlane.xlu1 %398 }
 0x3d3   :  { %870 = vrcp.f32 %v399_v58 }
 0x3d5   :  { %v865_v59 = vpop.eup %864 }
 0x3d6   :  { %v391_v60 = vmul.f32 %v865_v59, %v954_v50 }
 0x3d8   :  { %v392_v61 = vmax.f32 %v391_v60, 0.001 }
 0x3d9   :  { %v867_v62 = vpop.eup %866 }
 0x3da   :  { %v869_v63 = vpop.eup %868  ;;  %416 = vst [vmem:[%s991_s2 + $0x8] sm:$0xff] %v392_v61  ;;  %547 = vmatprep.mubr.f32.mxu0 %v392_v61  ;;  %v380_v0 = vmul.f32 %v867_v62, %v957_v51 }
 0x3db   :  { %v413_v1 = vmul.f32 %v869_v63, %v959_v52 }
 0x3dc   :  { %v381_v2 = vmax.f32 %v380_v0, 0.001 }
 0x3dd   :  { %v871_v3 = vpop.eup %870  ;;  %v414_v4 = vmax.f32 %v413_v1, 0.001 }
 0x3de   :  { %415 = vst [vmem:[%s991_s2] sm:$0xff] %v381_v2  ;;  %548 = vmatmul.mubr.f32.vlgmr.msra.gmra.mrb[4].mxu0 %v381_v2  ;;  %v402_v50 = vmul.f32 %v871_v3, %v963_v53 }
 0x3df   :  { %418 = vst [vmem:[%s991_s2 + $0x18] sm:$0xff] %v414_v4  ;;  %617 = vmatprep.mubr.f32.mxu1 %v414_v4 }
 0x3e0   :  { %v403_v5 = vmax.f32 %v402_v50, 0.001 }
 0x3e2   :  { %417 = vst [vmem:[%s991_s2 + $0x10] sm:$0xff] %v403_v5  ;;  %618 = vmatmul.mubr.f32.vlgmr.msra.gmra.mrb[4].mxu1 %v403_v5 }
 0x4b1   :  { %v705_v51 = vpop.f32.mrb[4].mxu0 }
 0x4b2   :  { %v706_v52 = vpop.f32.mrb[5].mxu0 }
 0x4b3   :  { %v707_v6 = vadd.f32 %v706_v52, %v705_v51 }
 0x4b5   :  { %v740_v8 = vpop.f32.mrb[4].mxu1 }
 0x4b6   :  { %v741_v9 = vpop.f32.mrb[5].mxu1 }
 0x4b7   :  { %v742_v10 = vadd.f32 %v741_v9, %v740_v8 }
 0x4b9   :  { %v620_v53 = vadd.f32 %v742_v10, %v707_v6 }
 0x4bb   :  { %v627_v11 = vsel %vm626_vm3, %v620_v53, -inf  ;;  %623 = vst [vmem:[%s992_s3] sm:$0xff] %v620_v53 }
 0x4bc   :  { %628 = vmax.xlane.f32.xlu0 %v627_v11 }
 0x549   :  { %v629_v12 = vpop.xlane.xlu0 %628 }
 0x54a   :  { %vm630_vm4 = vcmp.eq.f32.partialorder %v627_v11, %v629_v12 }
 0x54b   :  { %v631_v13 = vsel %vm630_vm4, %v625_v7, 128 }
 0x54c   :  { %v633_v14 = vshra.s32 %v631_v13, 16  ;;  %v632_v16 = vand.u32 65535, %v631_v13 }
 0x54e   :  { %v635_v15 = vcvt.s32.f32 %v633_v14  ;;  %v634_v46 = vcvt.s32.f32 %v632_v16 }
 0x550   :  { %636 = vmin.xlane.f32.xlu1 %v635_v15 }
 0x5dd   :  { %v637_v17 = vpop.xlane.xlu1 %636 }
 0x5de   :  { %vm638_vm5 = vcmp.eq.f32.partialorder %v635_v15, %v637_v17  ;;  %v643_v19 = vcvt.f32.s32 %v637_v17 }
 0x5df   :  { %v639_v18 = vsel %vm638_vm5, %v634_v46, inf }
 0x5e0   :  { %640 = vmin.xlane.f32.xlu0 %v639_v18  ;;  %v644_v21 = vshll.u32 %v643_v19, 16 }
 0x66d   :  { %v641_v20 = vpop.xlane.xlu0 %640 }
 0x66e   :  { %v642_v22 = vcvt.f32.s32 %v641_v20 }
 0x670   :  { %v645_v23 = vadd.s32 %v644_v21, %v642_v22 }
 0x672   :  { %647 = vst.msk [vmem:[%s993_s4] sm:$0xff] %vm646_vm6, %v645_v23 }
 0x673   :  { %660 = vsyncpa [#allocation3], 1 }

</bundles_post_ra>
